<compile_context>
chip_gen: v5e
topology: v5e:2x2
jax: 0.10.0
libtpu: 0.0.40
codegen_flags: <defaults>
</compile_context>

<pallas_src>
import functools

import jax
import jax.numpy as jnp
from jax.experimental import pallas as pl
from jax.experimental.pallas import tpu as pltpu


def _maskgam_kernel(x_ref, y_ref, w1x_ref, w1y_ref, b1_ref, wp_ref, bp_ref,
                    *out_refs):
    out_ref = out_refs[0]
    x = x_ref[0]                                   # (Cin, tm)   lane-dense
    y = y_ref[0]                                   # (Cin, tm)

    # Fused wx/wy branches (BN folded), combined bias, ReLU.  f32 accumulate.
    h = (jnp.dot(w1x_ref[...], x, preferred_element_type=jnp.float32)
         + jnp.dot(w1y_ref[...], y, preferred_element_type=jnp.float32)
         + b1_ref[...])                            # (Cmid, tm)
    h = jnp.maximum(h, 0.0)

    # psi branch (BN folded) + sigmoid.
    a = jnp.dot(wp_ref[...], h, preferred_element_type=jnp.float32) + bp_ref[...]
    att = jax.nn.sigmoid(a).astype(out_ref.dtype)  # (Cout, tm) in output dtype

    # out = x * att  (row-broadcast when Cout == 1, like PyTorch NCHW bcast).
    # Multiply in the input/output dtype: keeps bf16 traffic bf16 on v6e/v7x.
    out_ref[0] = x * att
    if len(out_refs) == 2:                         # optional att writeback
        out_refs[1][0] = att


def _fold_bn(w, b, gamma, beta, mean, var, eps=1e-5):
    """Fold inference-mode BatchNorm into a channel-major 1x1 conv.

    w: (Cout, Cin), b: (Cout,).  Returns w_f (Cout, Cin), b_f (Cout, 1).
    """
    scale = gamma / jnp.sqrt(var + eps)            # (Cout,)
    w_f = w * scale[:, None]
    b_f = (b - mean) * scale + beta
    return w_f, b_f[:, None]


def _pick_tile(hw, batch, cap):
    """Spatial (lane) tile: bounded by `cap`, multiple of 128 whenever possible."""
    cap = max(128, (cap // 128) * 128)
    if hw <= 128:
        return hw                                  # tiny image: single full-row block
    if hw % 128 != 0 and hw <= cap:
        return hw                                  # bounded full row (<= cap), legal
    tm = min(cap, (hw // 128) * 128)               # multiple of 128, <= hw
    if batch == 1 and tm >= hw:
        # Guarantee >= 2 grid steps so both v7x TensorCores get work.
        tm = max(128, ((hw - 1) // 128) * 128)
    return tm


@functools.partial(jax.jit, static_argnames=("tm_cap", "return_att"))
def maskgam_forward(x_nchw, y_nchw, params, *, tm_cap=32768, return_att=True):
    N, Cin, H, W = x_nchw.shape
    w1x, w1y, b1, wp, bp = params
    Cmid = w1x.shape[0]
    Cout = wp.shape[0]
    assert Cout == 1 or Cout == Cin, "x * att broadcast needs Cout in {1, Cin}"

    HW = H * W
    tm = _pick_tile(HW, N, tm_cap)
    grid = (N, pl.cdiv(HW, tm))                    # tail block padded by Pallas

    # Free reshapes (no transpose, no host padding): channel-major per image,
    # big spatial axis on the 128-lane dimension -> lane-dense loads/stores.
    xf = x_nchw.reshape(N, Cin, HW)
    yf = y_nchw.reshape(N, Cin, HW)

    in_tile = pl.BlockSpec((1, Cin, tm), lambda n, t: (n, 0, t))
    w_full = lambda shape: pl.BlockSpec(shape, lambda n, t: (0, 0))

    out_shapes = [jax.ShapeDtypeStruct((N, Cin, HW), x_nchw.dtype)]
    out_specs = [pl.BlockSpec((1, Cin, tm), lambda n, t: (n, 0, t))]
    if return_att:
        out_shapes.append(jax.ShapeDtypeStruct((N, Cout, HW), x_nchw.dtype))
        out_specs.append(pl.BlockSpec((1, Cout, tm), lambda n, t: (n, 0, t)))

    # VMEM budget: sublane-padded (<=8 rows) double-buffered tiles for every
    # tensor operand plus headroom for in-kernel f32 temporaries; clamp to
    # [32 MiB, 56 MiB] so it is safe on v5e/v6e (128 MiB) and v7x (64 MiB).
    itemsize = max(jnp.dtype(x_nchw.dtype).itemsize, 4)
    tile_bytes = 8 * tm * itemsize
    n_bufs = 2 * (2 + (2 if return_att else 1))
    vmem_limit = int(min(max(tile_bytes * (n_bufs + 8), 32 << 20), 56 << 20))

    outs = pl.pallas_call(
        _maskgam_kernel,
        out_shape=tuple(out_shapes),
        grid_spec=pltpu.PrefetchScalarGridSpec(
            num_scalar_prefetch=0,
            grid=grid,
            in_specs=[in_tile,                      # x tile  (1, Cin, tm)
                      in_tile,                      # y tile  (1, Cin, tm)
                      w_full((Cmid, Cin)),          # wx (folded BN)
                      w_full((Cmid, Cin)),          # wy (folded BN)
                      w_full((Cmid, 1)),            # combined bias bx+by
                      w_full((Cout, Cmid)),         # psi weight (folded BN)
                      w_full((Cout, 1))],           # psi bias
            out_specs=out_specs),
        compiler_params=pltpu.CompilerParams(
            dimension_semantics=("parallel", "parallel"),
            vmem_limit_bytes=vmem_limit),
    )(xf, yf, w1x, w1y, b1, wp, bp)

    if return_att:
        out_flat, att_flat = outs
        return (out_flat.reshape(N, Cin, H, W),
                att_flat.reshape(N, Cout, H, W))
    out_flat = outs[0] if isinstance(outs, (list, tuple)) else outs
    return out_flat.reshape(N, Cin, H, W)


def make_params(key, in_planes, mid_planes, out_planes):
    """Deterministic synthetic parameters (conv + folded inference BN)."""
    ks = jax.random.split(key, 12)

    def conv_bn(k0, k1, k2, k3, cin, cout):
        w = jax.random.normal(k0, (cout, cin), jnp.float32) * 0.1
        b = jax.random.normal(k1, (cout,), jnp.float32) * 0.1
        gamma = 1.0 + 0.1 * jax.random.normal(k2, (cout,), jnp.float32)
        beta = 0.1 * jax.random.normal(k3, (cout,), jnp.float32)
        mean = jnp.linspace(-0.2, 0.2, cout)
        var = jnp.linspace(0.5, 1.5, cout)
        return _fold_bn(w, b, gamma, beta, mean, var)

    wx, bx = conv_bn(ks[0], ks[1], ks[2], ks[3], in_planes, mid_planes)
    wy, by = conv_bn(ks[4], ks[5], ks[6], ks[7], in_planes, mid_planes)
    wp, bp = conv_bn(ks[8], ks[9], ks[10], ks[11], mid_planes, out_planes)
    return (wx, wy, bx + by, wp, bp)


def _ref_forward(x, y, params):
    """Pure-JAX reference (same folded-BN semantics)."""
    w1x, w1y, b1, wp, bp = params
    N, Cin, H, W = x.shape
    Cout = wp.shape[0]
    xf = x.reshape(N, Cin, -1)
    yf = y.reshape(N, Cin, -1)
    h = jnp.maximum(jnp.einsum("mc,ncs->nms", w1x, xf)
                    + jnp.einsum("mc,ncs->nms", w1y, yf) + b1[None], 0.0)
    att = jax.nn.sigmoid(jnp.einsum("om,nms->nos", wp, h) + bp[None])
    out = xf * att
    return out.reshape(N, Cin, H, W), att.reshape(N, Cout, H, W)


if __name__ == "__main__":
    key = jax.random.PRNGKey(0)
    kx, ky, kp, kx2, ky2 = jax.random.split(key, 5)

    N, Cin, H, W = 2, 4, 16, 16
    Cmid, Cout = 8, 1   # attention gate: out_planes = 1

    x = jax.random.normal(kx, (N, Cin, H, W), jnp.float32)
    y = jax.random.normal(ky, (N, Cin, H, W), jnp.float32)
    params = make_params(kp, Cin, Cmid, Cout)

    # 1) Standard path: (out, att), exact-fit blocks.
    out, att = maskgam_forward(x, y, params)
    out, att = jax.block_until_ready(out), jax.block_until_ready(att)
    out_ref, att_ref = _ref_forward(x, y, params)
    assert out.shape == (N, Cin, H, W) and att.shape == (N, Cout, H, W)
    assert jnp.allclose(out, out_ref, atol=1e-4, rtol=1e-4)
    assert jnp.allclose(att, att_ref, atol=1e-4, rtol=1e-4)

    # 2) out-only variant (drops the att writeback traffic).
    out_only = jax.block_until_ready(
        maskgam_forward(x, y, params, return_att=False))
    assert jnp.allclose(out_only, out_ref, atol=1e-4, rtol=1e-4)

    # 3) Non-multiple-of-128 spatial size exercising the cdiv tail block
    #    (HW = 195 with tm = 128 -> grid (1, 2), padded/masked tail).
    x2 = jax.random.normal(kx2, (1, Cin, 15, 13), jnp.float32)
    y2 = jax.random.normal(ky2, (1, Cin, 15, 13), jnp.float32)
    out2, att2 = maskgam_forward(x2, y2, params, tm_cap=128)
    out2, att2 = jax.block_until_ready(out2), jax.block_until_ready(att2)
    out2_ref, att2_ref = _ref_forward(x2, y2, params)
    assert jnp.allclose(out2, out2_ref, atol=1e-4, rtol=1e-4)
    assert jnp.allclose(att2, att2_ref, atol=1e-4, rtol=1e-4)

    print("KERNEL_OK")
</pallas_src>

<mosaic_0001>
module attributes {stable_mosaic.version = 11 : i64} {
  func.func @_maskgam_kernel(%arg0: i32, %arg1: i32, %arg2: memref<1x4x256xf32, #tpu.memory_space<vmem>>, %arg3: memref<1x4x256xf32, #tpu.memory_space<vmem>>, %arg4: memref<8x4xf32, #tpu.memory_space<vmem>>, %arg5: memref<8x4xf32, #tpu.memory_space<vmem>>, %arg6: memref<8x1xf32, #tpu.memory_space<vmem>>, %arg7: memref<1x8xf32, #tpu.memory_space<vmem>>, %arg8: memref<1x1xf32, #tpu.memory_space<vmem>>, %arg9: memref<1x4x256xf32, #tpu.memory_space<vmem>>, %arg10: memref<1x1x256xf32, #tpu.memory_space<vmem>>) attributes {dimension_semantics = [#tpu.dimension_semantics<parallel>, #tpu.dimension_semantics<parallel>], iteration_bounds = array<i64: 2, 1>, scalar_prefetch = 0 : i64, scratch_operands = 0 : i64, tpu.core_type = #tpu.core_type<tc>, window_params = [{transform_indices = @transform_0, window_bounds = array<i64: 1, 4, 256>}, {transform_indices = @transform_1, window_bounds = array<i64: 1, 4, 256>}, {pipeline_mode = #tpu.pipeline_mode<synchronous>, transform_indices = @transform_2, window_bounds = array<i64: 8, 4>}, {pipeline_mode = #tpu.pipeline_mode<synchronous>, transform_indices = @transform_3, window_bounds = array<i64: 8, 4>}, {pipeline_mode = #tpu.pipeline_mode<synchronous>, transform_indices = @transform_4, window_bounds = array<i64: 8, 1>}, {pipeline_mode = #tpu.pipeline_mode<synchronous>, transform_indices = @transform_5, window_bounds = array<i64: 1, 8>}, {pipeline_mode = #tpu.pipeline_mode<synchronous>, transform_indices = @transform_6, window_bounds = array<i64: 1, 1>}, {transform_indices = @transform_7, window_bounds = array<i64: 1, 4, 256>}, {transform_indices = @transform_8, window_bounds = array<i64: 1, 1, 256>}]} {
    %c0 = arith.constant 0 : index
    %c0_0 = arith.constant 0 : index
    %c0_1 = arith.constant 0 : index
    %0 = vector.load %arg2[%c0, %c0_0, %c0_1] : memref<1x4x256xf32, #tpu.memory_space<vmem>>, vector<1x4x256xf32>
    %1 = vector.shape_cast %0 : vector<1x4x256xf32> to vector<4x256xf32>
    %c0_2 = arith.constant 0 : index
    %c0_3 = arith.constant 0 : index
    %c0_4 = arith.constant 0 : index
    %2 = vector.load %arg3[%c0_2, %c0_3, %c0_4] : memref<1x4x256xf32, #tpu.memory_space<vmem>>, vector<1x4x256xf32>
    %3 = vector.shape_cast %2 : vector<1x4x256xf32> to vector<4x256xf32>
    %c0_5 = arith.constant 0 : index
    %c0_6 = arith.constant 0 : index
    %4 = vector.load %arg4[%c0_5, %c0_6] : memref<8x4xf32, #tpu.memory_space<vmem>>, vector<8x4xf32>
    %cst = arith.constant dense<0.000000e+00> : vector<8x256xf32>
    %5 = tpu.matmul %4, %1, %cst {dimension_numbers = #tpu.dot_dimension_numbers<[1], [0], [0], [1], [0, 0, 1, 1], [], []>} : vector<8x4xf32>, vector<4x256xf32>, vector<8x256xf32> -> vector<8x256xf32>
    %c0_7 = arith.constant 0 : index
    %c0_8 = arith.constant 0 : index
    %6 = vector.load %arg5[%c0_7, %c0_8] : memref<8x4xf32, #tpu.memory_space<vmem>>, vector<8x4xf32>
    %cst_9 = arith.constant dense<0.000000e+00> : vector<8x256xf32>
    %7 = tpu.matmul %6, %3, %cst_9 {dimension_numbers = #tpu.dot_dimension_numbers<[1], [0], [0], [1], [0, 0, 1, 1], [], []>} : vector<8x4xf32>, vector<4x256xf32>, vector<8x256xf32> -> vector<8x256xf32>
    %8 = arith.addf %5, %7 : vector<8x256xf32>
    %c0_10 = arith.constant 0 : index
    %c0_11 = arith.constant 0 : index
    %9 = vector.load %arg6[%c0_10, %c0_11] : memref<8x1xf32, #tpu.memory_space<vmem>>, vector<8x1xf32>
    %10 = vector.broadcast %9 : vector<8x1xf32> to vector<8x256xf32>
    %11 = arith.addf %8, %10 : vector<8x256xf32>
    %cst_12 = arith.constant 0.000000e+00 : f32
    %12 = vector.broadcast %cst_12 : f32 to vector<8x256xf32>
    %13 = arith.maximumf %11, %12 : vector<8x256xf32>
    %c0_13 = arith.constant 0 : index
    %c0_14 = arith.constant 0 : index
    %14 = vector.load %arg7[%c0_13, %c0_14] : memref<1x8xf32, #tpu.memory_space<vmem>>, vector<1x8xf32>
    %cst_15 = arith.constant dense<0.000000e+00> : vector<1x256xf32>
    %15 = tpu.matmul %14, %13, %cst_15 {dimension_numbers = #tpu.dot_dimension_numbers<[1], [0], [0], [1], [0, 0, 1, 1], [], []>} : vector<1x8xf32>, vector<8x256xf32>, vector<1x256xf32> -> vector<1x256xf32>
    %c0_16 = arith.constant 0 : index
    %c0_17 = arith.constant 0 : index
    %16 = vector.load %arg8[%c0_16, %c0_17] : memref<1x1xf32, #tpu.memory_space<vmem>>, vector<1x1xf32>
    %17 = vector.broadcast %16 : vector<1x1xf32> to vector<1x256xf32>
    %18 = arith.addf %15, %17 : vector<1x256xf32>
    %19 = arith.negf %18 : vector<1x256xf32>
    %20 = math.exp %19 : vector<1x256xf32>
    %cst_18 = arith.constant 1.000000e+00 : f32
    %21 = vector.broadcast %cst_18 : f32 to vector<1x256xf32>
    %22 = arith.addf %21, %20 : vector<1x256xf32>
    %23 = arith.divf %21, %22 : vector<1x256xf32>
    %24 = vector.broadcast %23 : vector<1x256xf32> to vector<4x256xf32>
    %25 = arith.mulf %1, %24 : vector<4x256xf32>
    %c0_19 = arith.constant 0 : index
    %c0_20 = arith.constant 0 : index
    %c0_21 = arith.constant 0 : index
    %26 = vector.load %arg9[%c0_19, %c0_20, %c0_21] : memref<1x4x256xf32, #tpu.memory_space<vmem>>, vector<1x4x256xf32>
    %27 = vector.shape_cast %26 : vector<1x4x256xf32> to vector<4x256xf32>
    %28 = vector.shape_cast %25 : vector<4x256xf32> to vector<1x4x256xf32>
    tpu.vector_store %arg9[%c0_19, %c0_20, %c0_21], %28 {strides = array<i32>} : memref<1x4x256xf32, #tpu.memory_space<vmem>>, vector<1x4x256xf32>,
    %c0_22 = arith.constant 0 : index
    %c0_23 = arith.constant 0 : index
    %c0_24 = arith.constant 0 : index
    %29 = vector.load %arg10[%c0_22, %c0_23, %c0_24] : memref<1x1x256xf32, #tpu.memory_space<vmem>>, vector<1x1x256xf32>
    %30 = vector.shape_cast %29 : vector<1x1x256xf32> to vector<1x256xf32>
    %31 = vector.shape_cast %23 : vector<1x256xf32> to vector<1x1x256xf32>
    tpu.vector_store %arg10[%c0_22, %c0_23, %c0_24], %31 {strides = array<i32>} : memref<1x1x256xf32, #tpu.memory_space<vmem>>, vector<1x1x256xf32>,
    return
  }
  func.func @transform_0(%arg0: i32, %arg1: i32) -> (i32, i32, i32) {
    %c0_i32 = arith.constant 0 : i32
    %c0_i32_0 = arith.constant 0 : i32
    return %arg0, %c0_i32, %arg1 : i32, i32, i32
  }
  func.func @transform_1(%arg0: i32, %arg1: i32) -> (i32, i32, i32) {
    %c0_i32 = arith.constant 0 : i32
    %c0_i32_0 = arith.constant 0 : i32
    return %arg0, %c0_i32, %arg1 : i32, i32, i32
  }
  func.func @transform_2(%arg0: i32, %arg1: i32) -> (i32, i32) {
    %c0_i32 = arith.constant 0 : i32
    %c0_i32_0 = arith.constant 0 : i32
    %c0_i32_1 = arith.constant 0 : i32
    return %c0_i32, %c0_i32_0 : i32, i32
  }
  func.func @transform_3(%arg0: i32, %arg1: i32) -> (i32, i32) {
    %c0_i32 = arith.constant 0 : i32
    %c0_i32_0 = arith.constant 0 : i32
    %c0_i32_1 = arith.constant 0 : i32
    return %c0_i32, %c0_i32_0 : i32, i32
  }
  func.func @transform_4(%arg0: i32, %arg1: i32) -> (i32, i32) {
    %c0_i32 = arith.constant 0 : i32
    %c0_i32_0 = arith.constant 0 : i32
    %c0_i32_1 = arith.constant 0 : i32
    return %c0_i32, %c0_i32_0 : i32, i32
  }
  func.func @transform_5(%arg0: i32, %arg1: i32) -> (i32, i32) {
    %c0_i32 = arith.constant 0 : i32
    %c0_i32_0 = arith.constant 0 : i32
    %c0_i32_1 = arith.constant 0 : i32
    return %c0_i32, %c0_i32_0 : i32, i32
  }
  func.func @transform_6(%arg0: i32, %arg1: i32) -> (i32, i32) {
    %c0_i32 = arith.constant 0 : i32
    %c0_i32_0 = arith.constant 0 : i32
    %c0_i32_1 = arith.constant 0 : i32
    return %c0_i32, %c0_i32_0 : i32, i32
  }
  func.func @transform_7(%arg0: i32, %arg1: i32) -> (i32, i32, i32) {
    %c0_i32 = arith.constant 0 : i32
    %c0_i32_0 = arith.constant 0 : i32
    return %arg0, %c0_i32, %arg1 : i32, i32, i32
  }
  func.func @transform_8(%arg0: i32, %arg1: i32) -> (i32, i32, i32) {
    %c0_i32 = arith.constant 0 : i32
    %c0_i32_0 = arith.constant 0 : i32
    return %arg0, %c0_i32, %arg1 : i32, i32, i32
  }
}

</mosaic_0001>

<bundles_post_ra>
// kernel: maskgam_forward.1
= control target key start
LH: loop header
LB: loop body
LE: loop exit
PB: predicated region body
PF: predicated region fallthrough
CT: control target
= control target key end

     0   :  { %s918_s29 = smov 0   ;;  %s920_s30 = smov 0   ;;  %s987_s0 = inlined_call_operand.vmem [shape: f32[2,4,256], index: 0, kind: input, shape index: {}]   ;;  %s988_s1 = inlined_call_operand.vmem [shape: f32[2,4,256], index: 1, kind: input, shape index: {}]   ;;  %s989_s2 = inlined_call_operand.vmem [shape: f32[8,4], index: 2, kind: input, shape index: {}]   ;;  %s990_s3 = inlined_call_operand.vmem [shape: f32[8,4], index: 3, kind: input, shape index: {}]   ;;  %s991_s4 = inlined_call_operand.vmem [shape: f32[8,1], index: 4, kind: input, shape index: {}]   ;;  %s992_s5 = inlined_call_operand.vmem [shape: f32[1,8], index: 5, kind: input, shape index: {}]   ;;  %s993_s6 = inlined_call_operand.<no memory space> [shape: f32[1,1], index: 6, kind: input, shape index: {}]   ;;  %s994_s7 = inlined_call_operand.vmem [shape: f32[2,4,256], index: 7, kind: output, shape index: {0}]   ;;  %s995_s8 = inlined_call_operand.vmem [shape: f32[2,1,256], index: 8, kind: output, shape index: {1}]  }
   0x1   :  { %v14_v0 = vstv %s993_s6  ;;  %s922_s9 = smov 0  }
   0x2   :  { %15 = vst [vmem:[#allocation2] sm:$0x1] %v14_v0 }
   0x3 LB: > { %s33_s6 = sadd.s32 1, %s863_s30  ;;  %p786_p0 = scmp.ge.s32.totalorder %s867_s9, 1  ;;  %s867_s9 = sphi %s922_s9, %s21_s9   ;;  %s863_s30 = sphi %s920_s30, %s997_s30   ;;  %s859_s29 = sphi %s918_s29, %s996_s29  }
   0x4   : > { %p35_p1 = scmp.ge.s32.totalorder %s33_s6, 2  ;;  %p307_p2 = scmp.lt.s32.totalorder %s867_s9, 3 }
   0x6   : > { %s999_s6 = smov (%p35_p1, %s33_s6), 0  ;;  %p308_p3 = pnand %p786_p0, %p307_p2 }
   0x7   : > { %p367_p4 = scmp.lt.s32.totalorder (!%p308_p3), %s859_s29, 1 }
   0x8   : > { %311 = sbr.rel (%p308_p3) target bundleno = 338 (0x152), region = 48 }
   0xd   : > { %v869_v1 = vmov 0   ;;  %v513_v2 = vld [vmem:[%s991_s4] sm:$0xff]  ;;  %s1001_s29 = smov (!%p367_p4, %s859_s29), 1  ;;  %v524_v4 = vld [vmem:[#allocation2] sm:$0x1]  ;;  %vm417_vm0 = vcmask 1043456   ;;  %v628_v50 = vlaneseq }
   0xe   : > { %836 = vset.pattern.permute.xlu0 %v869_v1  ;;  %s942_s12 = sshll.u32 %s1001_s29, 3  ;;  %v408_v6 = vld [vmem:[%s990_s3] sm:$0xff]  ;;  %vm413_vm1 = vcmask 31744   ;;  %vm531_vm2 = vcmask 64512   ;;  %s793_s25 = sshll.u32 %s1001_s29, 1  ;;  %vm625_vm11 = vcmask 1040384  }
   0xf   : > { %516 = vperm.xlu0 %836, %v513_v2   ;;  %s384_s15 = scalar_lea.vmem %s988_s1, %s942_s12  ;;  %s374_s18 = scalar_lea.vmem %s987_s0, %s942_s12  ;;  %v407_v9 = vld [vmem:[%s989_s2] sm:$0xff]  ;;  %vm630_vm12 = vcmp.lt.s32.totalorder %v628_v50, 256 }
  0x10   : > { %v406_v3 = vld [vmem:[%s384_s15] sm:$0xff]  ;;  %s403_s28 = scalar_lea.vmem %s995_s8, %s793_s25  ;;  %s394_s11 = scalar_lea.vmem %s994_s7, %s942_s12 }
  0x11   : > { %410 = vst [vmem:[#allocation1] ss:$2 sm:$0xff] %v406_v3  ;;  %v952_v5 = vld [vmem:[%s374_s18] sm:$0xff] }
  0x12   : > { %v523_v23 = vld [vmem:[%s992_s5] sm:$0x1] }
  0x17   : > { %527 = vperm.xlu0 %836, %v524_v4  }
  0x18   : > { %v411_v7 = vld.sshfl [vmem:[#allocation1] sm:$0xff pattern:$0x75316420]  ;;  %v412_v8 = vld.sshfl [vmem:[#allocation1 + $0x8] sm:$0xff pattern:$0x75316420] }
  0x19   : > { %463 = vst [vmem:[#allocation1] ss:$2 sm:$0xff] %v952_v5  ;;  %794 = vmatpush.msk.msra.mxu0 %vm417_vm0, %v411_v7  ;;  %796 = vmatpush.msk.msra.mxu1 %vm417_vm0, %v412_v8 }
  0x1a   : > { %795 = vmatmul.msk.f32.vlgmr.msra.gmra.mxu0 %vm413_vm1, %v408_v6  ;;  %797 = vmatmul.msk.f32.vlgmr.msra.gmra.mxu1 %vm413_vm1, %v408_v6 }
  0x20   : > { %v464_v10 = vld.sshfl [vmem:[#allocation1] sm:$0xff pattern:$0x75316420]  ;;  %v465_v11 = vld.sshfl [vmem:[#allocation1 + $0x8] sm:$0xff pattern:$0x75316420] }
  0x21   : > { %798 = vmatpush.msk.msra.mxu2 %vm417_vm0, %v464_v10  ;;  %800 = vmatpush.msk.msra.mxu3 %vm417_vm0, %v465_v11 }
  0x22   : > { %799 = vmatmul.msk.f32.vlgmr.msra.gmra.mxu2 %vm413_vm1, %v407_v9  ;;  %801 = vmatmul.msk.f32.vlgmr.msra.gmra.mxu3 %vm413_vm1, %v407_v9 }
  0x81   : > { %v517_v18 = vpop.permute.xlu0 %516 }
  0x89   : > { %v528_v24 = vpop.permute.xlu0 %527 }
  0x8a   : > { %v530_v25 = vperm.slane %v528_v24, 0 }
  0x97   : > { %v439_v12 = vpop.f32.mrf.mxu0  ;;  %v459_v13 = vpop.f32.mrf.mxu1 }
  0xa5   : > { %v490_v14 = vpop.f32.mrf.mxu2  ;;  %v510_v15 = vpop.f32.mrf.mxu3 }
  0xa6   : > { %v491_v16 = vadd.f32 %v490_v14, %v439_v12  ;;  %v511_v17 = vadd.f32 %v510_v15, %v459_v13 }
  0xa8   : > { %v519_v19 = vadd.f32 %v517_v18, %v491_v16  ;;  %v520_v20 = vadd.f32 %v517_v18, %v511_v17 }
  0xaa   : > { %v521_v21 = vmax.f32 %v519_v19, 0.0  ;;  %v522_v22 = vmax.f32 %v520_v20, 0.0 }
  0xac   : > { %550 = vmatpush.msrb.mxu0 %v521_v21  ;;  %570 = vmatpush.msrb.mxu1 %v522_v22 }
  0xad   : > { %802 = vmatmul.msk.f32.vlgmr.msrb.gmra.mxu0 %vm531_vm2, %v523_v23  ;;  %803 = vmatmul.msk.f32.vlgmr.msrb.gmra.mxu1 %vm531_vm2, %v523_v23 }
 0x12a   : > { %v552_v26 = vpop.f32.mrf.mxu0  ;;  %v572_v27 = vpop.f32.mrf.mxu1 }
 0x12b   : > { %v553_v28 = vadd.f32 %v552_v26, %v530_v25  ;;  %v573_v29 = vadd.f32 %v572_v27, %v530_v25 }
 0x12d   : > { %v804_v30 = vmul.f32 -1.442695, %v553_v28  ;;  %v805_v31 = vmul.f32 -1.442695, %v573_v29 }
 0x12f   : > { %837 = vpow2.f32 %v804_v30 }
 0x130   : > { %839 = vpow2.f32 %v805_v31 }
 0x135   : > { %v838_v32 = vpop.eup %837 }
 0x136   : > { %v840_v33 = vpop.eup %839  ;;  %v581_v34 = vadd.f32 1.0, %v838_v32 }
 0x137   : > { %v582_v35 = vadd.f32 1.0, %v840_v33 }
 0x138   : > { %841 = vrcp.f32 %v581_v34  ;;  %v594_v43 = vand.u32 2147483648, %v581_v34  ;;  %v592_v45 = vand.u32 2147483647, %v581_v34  ;;  %vm588_vm5 = vweird.f32 %v581_v34 }
 0x139   : > { %843 = vrcp.f32 %v582_v35  ;;  %v609_v44 = vand.u32 2147483648, %v582_v35  ;;  %v607_v47 = vand.u32 2147483647, %v582_v35  ;;  %vm603_vm7 = vweird.f32 %v582_v35 }
 0x13a   : > { %v595_v52 = vor.u32 1.1754944e-38, %v594_v43  ;;  %vm593_vm9 = vcmp.eq.f32.partialorder %v592_v45, 8.507059e+37 }
 0x13b   : > { %v610_v53 = vor.u32 1.1754944e-38, %v609_v44  ;;  %vm608_vm10 = vcmp.eq.f32.partialorder %v607_v47, 8.507059e+37 }
 0x13e   : > { %v842_v36 = vpop.eup %841 }
 0x13f   : > { %v844_v37 = vpop.eup %843  ;;  %v584_v38 = vmul.f32 %v842_v36, %v581_v34  ;;  %vm589_vm3 = vweird.f32 %v842_v36 }
 0x140   : > { %v599_v39 = vmul.f32 %v844_v37, %v582_v35  ;;  %vm604_vm4 = vweird.f32 %v844_v37  ;;  %vm590_vm6 = vmor %vm588_vm5, %vm589_vm3 }
 0x141   : > { %v585_v40 = vsub.f32 1.0, %v584_v38  ;;  %vm605_vm8 = vmor %vm603_vm7, %vm604_vm4 }
 0x142   : > { %v600_v41 = vsub.f32 1.0, %v599_v39 }
 0x143   : > { %v586_v42 = vmul.f32 %v842_v36, %v585_v40 }
 0x144   : > { %v601_v46 = vmul.f32 %v844_v37, %v600_v41 }
 0x145   : > { %v587_v48 = vadd.f32 %v842_v36, %v586_v42 }
 0x146   : > { %v602_v49 = vadd.f32 %v844_v37, %v601_v46 }
 0x147   : > { %v591_v51 = vsel %vm590_vm6, %v842_v36, %v587_v48 }
 0x148   : > { %v606_v54 = vsel %vm605_vm8, %v844_v37, %v602_v49  ;;  %v596_v55 = vsel %vm593_vm9, %v595_v52, %v591_v51 }
 0x149   : > { %v611_v56 = vsel %vm608_vm10, %v610_v53, %v606_v54  ;;  %v613_v59 = vperm.slane %v596_v55, 0 }
 0x14a   : > { %v614_v57 = vperm.slane %v611_v56, 0  ;;  %v624_v58 = vrot.slane %v611_v56, 7 }
 0x14c   : > { %v617_v60 = vrot.slane %v614_v57, 4  ;;  %v626_v61 = vsel %vm625_vm11, %v596_v55, %v624_v58 }
 0x14d   : > { %632 = vst.msk [vmem:[%s403_s28] sm:$0x3] %vm630_vm12, %v626_v61 }
 0x14e   : > { %v618_v62 = vsel %vm417_vm0, %v613_v59, %v617_v60 }
 0x14f   : > { %v620_v63 = vmul.f32 %v618_v62, %v952_v5 }
 0x151   : > { %621 = vst [vmem:[%s394_s11] sm:$0xff] %v620_v63 }
 0x152 PF: > { %s21_s9 = sadd.s32 1, %s867_s9   ;;  %s996_s29 = smov %s863_s30 }
 0x153   : > { %p18_p5 = scmp.ge.s32.totalorder %s21_s9, 4   ;;  %s997_s30 = smov %s999_s6 }
 0x155   :  { %20 = sbr.rel (!%p18_p5) target bundleno = 3 (0x3), region = 93 }

</bundles_post_ra>
